<compile_context>
chip_gen: v6e
topology: v6e:2x2x1
jax: 0.10.0
libtpu: 0.0.40
codegen_flags: <defaults>
</compile_context>

<pallas_src>
import math
from functools import partial

import jax
import jax.numpy as jnp
from jax.experimental import pallas as pl
from jax.experimental.pallas import tpu as pltpu

# torch F.rms_norm default eps for float32 input: torch.finfo(torch.float32).eps
_EPS = 1.1920928955078125e-07

_LANES = 128
_BLOCK_VMEM_BUDGET = 24 * 1024 * 1024  # in + out, double-buffered => ~4 live blocks
_VMEM_LIMIT = 48 * 1024 * 1024         # safe on v5e/v6e (128 MiB) and v7x (64 MiB)
_MAX_BLOCK_ROWS = 1024


# --------------------------- generic (D >= 128 or irregular D) ---------------------------

def _rmsnorm_kernel(x_ref, o_ref):
    xf = x_ref[...].astype(jnp.float32)
    inv = jax.lax.rsqrt(jnp.mean(xf * xf, axis=-1, keepdims=True) + _EPS)
    # Re-read + cast per-vreg at store time: avoids keeping a (TR, D) f32 temp
    # live across the reduction (would spill to a VMEM temp + extra vld/vst).
    o_ref[...] = (x_ref[...].astype(jnp.float32) * inv).astype(o_ref.dtype)


def _rmsnorm_affine_kernel(x_ref, w_ref, o_ref):
    xf = x_ref[...].astype(jnp.float32)
    inv = jax.lax.rsqrt(jnp.mean(xf * xf, axis=-1, keepdims=True) + _EPS)
    w = w_ref[...].astype(jnp.float32)  # (1, D) broadcasts over the row block
    o_ref[...] = (x_ref[...].astype(jnp.float32) * inv * w).astype(o_ref.dtype)


# ------------------------- lane-dense small-D path (D < 128, 128 % D == 0) ---------------

def _rmsnorm_packed_kernel(dim, x_ref, seg_ref, o_ref):
    # x_ref: (TR, 128); each lane row holds F = 128 // dim logical rows.
    xf = x_ref[...].astype(jnp.float32)
    seg = seg_ref[...]                                                     # (128, F) 0/1
    sums = jnp.dot(xf * xf, seg, preferred_element_type=jnp.float32)       # (TR, F)
    inv = jax.lax.rsqrt(sums * (1.0 / dim) + _EPS)                         # (TR, F)
    scale = jnp.dot(inv, seg.T, preferred_element_type=jnp.float32)        # (TR, 128)
    o_ref[...] = (x_ref[...].astype(jnp.float32) * scale).astype(o_ref.dtype)


def _rmsnorm_packed_affine_kernel(dim, x_ref, seg_ref, w_ref, o_ref):
    xf = x_ref[...].astype(jnp.float32)
    seg = seg_ref[...]
    sums = jnp.dot(xf * xf, seg, preferred_element_type=jnp.float32)
    inv = jax.lax.rsqrt(sums * (1.0 / dim) + _EPS)
    scale = jnp.dot(inv, seg.T, preferred_element_type=jnp.float32)
    o_ref[...] = (x_ref[...].astype(jnp.float32) * scale * w_ref[...]).astype(o_ref.dtype)


# --------------------------------------- wrapper ------------------------------------------

def _choose_block_rows(n_rows, row_elems, itemsize):
    """Largest row-tile whose double-buffered in+out blocks fit the VMEM budget."""
    # Sublane granularity including sub-32-bit packing (f32 -> 8, bf16 -> 16, i8 -> 32).
    gran = 8 * max(1, 4 // itemsize)
    row_bytes = row_elems * itemsize
    tr = _BLOCK_VMEM_BUDGET // (4 * row_bytes)
    tr = min(tr, _MAX_BLOCK_ROWS)
    if tr >= n_rows:
        return n_rows
    tr = max(gran, (tr // gran) * gran)
    return min(tr, n_rows)


def rmsnorm_forward(x, weight=None):
    """RMSNorm over the last dim of x (any leading shape); optional affine weight."""
    orig_shape = x.shape
    D = orig_shape[-1]
    if weight is not None:
        assert weight.shape == (D,), f"expected weight shape ({D},), got {weight.shape}"
    R = math.prod(orig_shape[:-1]) if len(orig_shape) > 1 else 1
    itemsize = jnp.dtype(x.dtype).itemsize

    fold = _LANES // D if (D < _LANES and _LANES % D == 0) else 1
    use_packed = fold > 1 and R % fold == 0

    cparams = pltpu.CompilerParams(
        dimension_semantics=("parallel",),
        vmem_limit_bytes=_VMEM_LIMIT,
    )
    flops = 3 * R * D + (R * D if weight is not None else 0)
    w_bytes = D * jnp.dtype(weight.dtype).itemsize if weight is not None else 0
    cost = pl.CostEstimate(
        flops=flops,
        transcendentals=R,
        bytes_accessed=2 * R * D * itemsize + w_bytes,
    )

    if use_packed:
        # Fold F = 128 // D rows per lane row: lane-dense loads/stores, MXU reduce.
        Rp = R // fold
        x2 = x.reshape(Rp, _LANES)
        TR = _choose_block_rows(Rp, _LANES, itemsize)
        grid = (pl.cdiv(Rp, TR),)

        lane = jax.lax.broadcasted_iota(jnp.int32, (_LANES, fold), 0)
        segi = jax.lax.broadcasted_iota(jnp.int32, (_LANES, fold), 1)
        seg = (lane // D == segi).astype(jnp.float32)  # (128, F) 0/1 segment matrix

        in_specs = [
            pl.BlockSpec((TR, _LANES), lambda i: (i, 0)),
            pl.BlockSpec((_LANES, fold), lambda i: (0, 0)),
        ]
        args = [x2, seg]
        if weight is None:
            kern = partial(_rmsnorm_packed_kernel, D)
        else:
            kern = partial(_rmsnorm_packed_affine_kernel, D)
            w_tiled = jnp.tile(weight.astype(jnp.float32), (fold,)).reshape(1, _LANES)
            in_specs.append(pl.BlockSpec((1, _LANES), lambda i: (0, 0)))
            args.append(w_tiled)
        out_spec = pl.BlockSpec((TR, _LANES), lambda i: (i, 0))
        out_shape = jax.ShapeDtypeStruct((Rp, _LANES), x.dtype)
    else:
        x2 = x.reshape(R, D)
        TR = _choose_block_rows(R, D, itemsize)
        grid = (pl.cdiv(R, TR),)

        in_specs = [pl.BlockSpec((TR, D), lambda i: (i, 0))]
        args = [x2]
        if weight is None:
            kern = _rmsnorm_kernel
        else:
            kern = _rmsnorm_affine_kernel
            in_specs.append(pl.BlockSpec((1, D), lambda i: (0, 0)))
            args.append(weight.reshape(1, D))
        out_spec = pl.BlockSpec((TR, D), lambda i: (i, 0))
        out_shape = jax.ShapeDtypeStruct((R, D), x.dtype)

    y2 = pl.pallas_call(
        kern,
        out_shape=out_shape,
        grid=grid,
        in_specs=in_specs,
        out_specs=out_spec,
        compiler_params=cparams,
        cost_estimate=cost,
    )(*args)

    return y2.reshape(orig_shape)


def rmsnorm_reference(x, weight=None, eps=_EPS):
    """Pure-JAX reference matching torch F.rms_norm(x.float(), (D,), w).type_as(x)."""
    xf = x.astype(jnp.float32)
    ms = jnp.mean(xf * xf, axis=-1, keepdims=True)
    y = xf * jax.lax.rsqrt(ms + eps)
    if weight is not None:
        y = y * weight.astype(jnp.float32)
    return y.astype(x.dtype)


# TODO(synk): for extremely large D (where even the minimum row tile would exceed the
# VMEM budget) a D-tiled two-pass variant (sum-of-squares accumulate, then scale) would
# be needed; not implemented since realistic D always fits the row-tiled path.

if __name__ == "__main__":
    key = jax.random.PRNGKey(0)
    kx1, kw1, kx2, kw2 = jax.random.split(key, 4)

    # --- small-D lane-dense path (D=32 < 128, bf16) ---
    N, T, D = 2, 16, 32
    x = jax.random.normal(kx1, (N, T, D), dtype=jnp.float32).astype(jnp.bfloat16)

    y = jax.block_until_ready(rmsnorm_forward(x))
    y_ref = rmsnorm_reference(x)
    assert y.shape == x.shape and y.dtype == x.dtype
    assert jnp.allclose(
        y.astype(jnp.float32), y_ref.astype(jnp.float32), atol=2e-2, rtol=2e-2
    ), "mismatch vs reference (packed, affine=False)"

    w = 1.0 + 0.1 * jax.random.normal(kw1, (D,), dtype=jnp.float32)
    y_a = jax.block_until_ready(rmsnorm_forward(x, w))
    y_a_ref = rmsnorm_reference(x, w)
    assert y_a.shape == x.shape and y_a.dtype == x.dtype
    assert jnp.allclose(
        y_a.astype(jnp.float32), y_a_ref.astype(jnp.float32), atol=2e-2, rtol=2e-2
    ), "mismatch vs reference (packed, affine=True)"

    # --- generic path (D=256 >= 128, f32) ---
    N2, T2, D2 = 2, 8, 256
    x2 = jax.random.normal(kx2, (N2, T2, D2), dtype=jnp.float32)

    y2 = jax.block_until_ready(rmsnorm_forward(x2))
    y2_ref = rmsnorm_reference(x2)
    assert y2.shape == x2.shape and y2.dtype == x2.dtype
    assert jnp.allclose(y2, y2_ref, atol=1e-4, rtol=1e-4), \
        "mismatch vs reference (generic, affine=False)"

    w2 = 1.0 + 0.1 * jax.random.normal(kw2, (D2,), dtype=jnp.float32)
    y2_a = jax.block_until_ready(rmsnorm_forward(x2, w2))
    y2_a_ref = rmsnorm_reference(x2, w2)
    assert jnp.allclose(y2_a, y2_a_ref, atol=1e-4, rtol=1e-4), \
        "mismatch vs reference (generic, affine=True)"

    print("KERNEL_OK")
</pallas_src>

<mosaic_0001>
module attributes {stable_mosaic.version = 11 : i64} {
  func.func @_rmsnorm_packed_kernel(%arg0: i32, %arg1: memref<8x128xbf16, #tpu.memory_space<vmem>>, %arg2: memref<128x4xf32, #tpu.memory_space<vmem>>, %arg3: memref<8x128xbf16, #tpu.memory_space<vmem>>) attributes {dimension_semantics = [#tpu.dimension_semantics<parallel>], iteration_bounds = array<i64: 1>, scalar_prefetch = 0 : i64, scratch_operands = 0 : i64, tpu.core_type = #tpu.core_type<tc>, window_params = [{transform_indices = @transform_0, window_bounds = array<i64: 8, 128>}, {pipeline_mode = #tpu.pipeline_mode<synchronous>, transform_indices = @transform_1, window_bounds = array<i64: 128, 4>}, {transform_indices = @transform_2, window_bounds = array<i64: 8, 128>}]} {
    %c0 = arith.constant 0 : index
    %c0_0 = arith.constant 0 : index
    %0 = vector.load %arg1[%c0, %c0_0] : memref<8x128xbf16, #tpu.memory_space<vmem>>, vector<8x128xbf16>
    %1 = arith.extf %0 : vector<8x128xbf16> to vector<8x128xf32>
    %c0_1 = arith.constant 0 : index
    %c0_2 = arith.constant 0 : index
    %2 = vector.load %arg2[%c0_1, %c0_2] : memref<128x4xf32, #tpu.memory_space<vmem>>, vector<128x4xf32>
    %3 = arith.mulf %1, %1 : vector<8x128xf32>
    %cst = arith.constant dense<0.000000e+00> : vector<8x4xf32>
    %4 = tpu.matmul %3, %2, %cst {dimension_numbers = #tpu.dot_dimension_numbers<[1], [0], [0], [1], [0, 0, 1, 1], [], []>} : vector<8x128xf32>, vector<128x4xf32>, vector<8x4xf32> -> vector<8x4xf32>
    %cst_3 = arith.constant 3.125000e-02 : f32
    %5 = vector.broadcast %cst_3 : f32 to vector<8x4xf32>
    %6 = arith.mulf %4, %5 : vector<8x4xf32>
    %cst_4 = arith.constant 1.1920929E-7 : f32
    %7 = vector.broadcast %cst_4 : f32 to vector<8x4xf32>
    %8 = arith.addf %6, %7 : vector<8x4xf32>
    %9 = math.rsqrt %8 : vector<8x4xf32>
    %10 = tpu.transpose %2, [1, 0] : vector<128x4xf32> -> vector<4x128xf32>
    %cst_5 = arith.constant dense<0.000000e+00> : vector<8x128xf32>
    %11 = tpu.matmul %9, %10, %cst_5 {dimension_numbers = #tpu.dot_dimension_numbers<[1], [0], [0], [1], [0, 0, 1, 1], [], []>} : vector<8x4xf32>, vector<4x128xf32>, vector<8x128xf32> -> vector<8x128xf32>
    %c0_6 = arith.constant 0 : index
    %c0_7 = arith.constant 0 : index
    %12 = vector.load %arg1[%c0_6, %c0_7] : memref<8x128xbf16, #tpu.memory_space<vmem>>, vector<8x128xbf16>
    %13 = arith.extf %12 : vector<8x128xbf16> to vector<8x128xf32>
    %14 = arith.mulf %13, %11 : vector<8x128xf32>
    %15 = arith.truncf %14 : vector<8x128xf32> to vector<8x128xbf16>
    %c0_8 = arith.constant 0 : index
    %c0_9 = arith.constant 0 : index
    %16 = vector.load %arg3[%c0_8, %c0_9] : memref<8x128xbf16, #tpu.memory_space<vmem>>, vector<8x128xbf16>
    tpu.vector_store %arg3[%c0_8, %c0_9], %15 {strides = array<i32>} : memref<8x128xbf16, #tpu.memory_space<vmem>>, vector<8x128xbf16>,
    return
  }
  func.func @transform_0(%arg0: i32) -> (i32, i32) {
    %c0_i32 = arith.constant 0 : i32
    %c0_i32_0 = arith.constant 0 : i32
    return %arg0, %c0_i32 : i32, i32
  }
  func.func @transform_1(%arg0: i32) -> (i32, i32) {
    %c0_i32 = arith.constant 0 : i32
    %c0_i32_0 = arith.constant 0 : i32
    %c0_i32_1 = arith.constant 0 : i32
    return %c0_i32, %c0_i32_0 : i32, i32
  }
  func.func @transform_2(%arg0: i32) -> (i32, i32) {
    %c0_i32 = arith.constant 0 : i32
    %c0_i32_0 = arith.constant 0 : i32
    return %arg0, %c0_i32 : i32, i32
  }
}

</mosaic_0001>

<bundles_post_ra>
// kernel: tpu_custom_call.1
= control target key start
LH: loop header
LB: loop body
LE: loop exit
PB: predicated region body
PF: predicated region fallthrough
CT: control target
= control target key end

     0   :  { %vm104_vm0 = vcmask 31744   ;;  %v391_v1 = vmov 0.0   ;;  %vm392_vm1 = vmmov 0   ;;  %s514_s0 = inlined_call_operand.vmem [shape: bf16[8,128], index: 0, kind: input, shape index: {}]   ;;  %s515_s1 = inlined_call_operand.vmem [shape: f32[128,4], index: 1, kind: input, shape index: {}]   ;;  %s516_s2 = inlined_call_operand.hbm [shape: bf16[8,128], index: 2, kind: output, shape index: {}]  }
   0x1   :  { %v29_v0 = vld [vmem:[%s515_s1 + $0x78] sm:$0xff]  ;;  %294 = vmatprep.subr.mxu0 %v391_v1  ;;  %v28_v2 = vld [vmem:[%s515_s1 + $0x70] sm:$0xff]  ;;  %326 = vmatprep.mubr.msk.f32.mxu0 %vm392_vm1, %v391_v1  ;;  %v27_v3 = vld [vmem:[%s515_s1 + $0x68] sm:$0xff] }
   0x2   :  { %295 = vmatpush3.msra.mxu0 %v29_v0  ;;  %329 = vmatprep.subr.mxu1 %v391_v1  ;;  %v26_v4 = vld [vmem:[%s515_s1 + $0x60] sm:$0xff] }
   0x3   :  { %296 = vmatprep.subr.mxu0 %v391_v1  ;;  %330 = vmatpush3.xpose.msk.msra.mxu1 %vm104_vm0, %v29_v0 }
   0x4   :  { %297 = vmatpush3.msra.mxu0 %v28_v2  ;;  %331 = vmatprep.subr.mxu1 %v391_v1 }
   0x5   :  { %298 = vmatprep.subr.mxu0 %v391_v1  ;;  %361 = vmatprep.mubr.msk.f32.mxu1 %vm392_vm1, %v391_v1 }
   0x6   :  { %7 = vsyncpa [#allocation3], 0  ;;  %299 = vmatpush3.msra.mxu0 %v27_v3  ;;  %v25_v5 = vld [vmem:[%s515_s1 + $0x58] sm:$0xff]  ;;  %v24_v6 = vld [vmem:[%s515_s1 + $0x50] sm:$0xff] }
   0x7   :  { %300 = vmatprep.subr.mxu0 %v391_v1  ;;  %332 = vmatpush3.xpose.msk.msra.mxu1 %vm104_vm0, %v28_v2  ;;  %v23_v7 = vld [vmem:[%s515_s1 + $0x48] sm:$0xff]  ;;  %v22_v8 = vld [vmem:[%s515_s1 + $0x40] sm:$0xff]  ;;  %v21_v9 = vld [vmem:[%s515_s1 + $0x38] sm:$0xff] }
   0x8   :  { %301 = vmatpush3.msra.mxu0 %v26_v4  ;;  %333 = vmatprep.subr.mxu1 %v391_v1  ;;  %v20_v10 = vld [vmem:[%s515_s1 + $0x30] sm:$0xff]  ;;  %v19_v11 = vld [vmem:[%s515_s1 + $0x28] sm:$0xff]  ;;  %v18_v12 = vld [vmem:[%s515_s1 + $0x20] sm:$0xff] }
   0x9   :  { %302 = vmatprep.subr.mxu0 %v391_v1  ;;  %v12_v13 = vld [vmem:[%s514_s0] sm:$0xf]  ;;  %v17_v14 = vld [vmem:[%s515_s1 + $0x18] sm:$0xff]  ;;  %v16_v15 = vld [vmem:[%s515_s1 + $0x10] sm:$0xff] }
   0xa   :  { %303 = vmatpush3.msra.mxu0 %v25_v5  ;;  %v13_v16 = vunpack.c.l.bf16 %v12_v13  ;;  %v15_v17 = vld [vmem:[%s515_s1 + $0x8] sm:$0xff]  ;;  %v14_v18 = vld [vmem:[%s515_s1] sm:$0xff]  ;;  %s393_s1 = smov [#allocation2]  }
   0xb   :  { %304 = vmatprep.subr.mxu0 %v391_v1  ;;  %334 = vmatpush3.xpose.msk.msra.mxu1 %vm104_vm0, %v27_v3  ;;  %s235_s14 = sshll.u32 %s393_s1, 4  ;;  %s236_s14 = int_to_ptr.vmem [resolvable:$true] %s235_s14 }
   0xc   :  { %305 = vmatpush3.msra.mxu0 %v24_v6  ;;  %335 = vmatprep.subr.mxu1 %v391_v1  ;;  %v30_v19 = vmul.f32 %v13_v16, %v13_v16  ;;  %s369_s15 = scalar_lea.vmem %s236_s14, 64  ;;  %p374_p1 = scmp.lt.s32.totalorder %s236_s14, %s236_s14 }
   0xd   :  { %306 = vmatprep.subr.mxu0 %v391_v1  ;;  %p370_p0 = scmp.ne.s32.totalorder %s236_s14, %s369_s15  ;;  %p375_p2 = scmp.lt.s32.totalorder %s369_s15, %s369_s15 }
   0xe   :  { %307 = vmatpush3.msra.mxu0 %v23_v7 }
   0xf   :  { %308 = vmatprep.subr.mxu0 %v391_v1  ;;  %336 = vmatpush3.xpose.msk.msra.mxu1 %vm104_vm0, %v26_v4  ;;  %p376_p3 = por %p375_p2, %p374_p1 }
  0x10   :  { %309 = vmatpush3.msra.mxu0 %v22_v8  ;;  %337 = vmatprep.subr.mxu1 %v391_v1 }
  0x11   :  { %310 = vmatprep.subr.mxu0 %v391_v1  ;;  %p377_p4 = pnand %p376_p3, %p370_p0 }
  0x12   :  { %311 = vmatpush3.msra.mxu0 %v21_v9 }
  0x13   :  { %312 = vmatprep.subr.mxu0 %v391_v1  ;;  %338 = vmatpush3.xpose.msk.msra.mxu1 %vm104_vm0, %v25_v5 }
  0x14   :  { %313 = vmatpush3.msra.mxu0 %v20_v10  ;;  %339 = vmatprep.subr.mxu1 %v391_v1 }
  0x15   :  { %314 = vmatprep.subr.mxu0 %v391_v1 }
  0x16   :  { %315 = vmatpush3.msra.mxu0 %v19_v11 }
  0x17   :  { %316 = vmatprep.subr.mxu0 %v391_v1  ;;  %340 = vmatpush3.xpose.msk.msra.mxu1 %vm104_vm0, %v24_v6 }
  0x18   :  { %317 = vmatpush3.msra.mxu0 %v18_v12  ;;  %341 = vmatprep.subr.mxu1 %v391_v1 }
  0x19   :  { %318 = vmatprep.subr.mxu0 %v391_v1 }
  0x1a   :  { %319 = vmatpush3.msra.mxu0 %v17_v14 }
  0x1b   :  { %320 = vmatprep.subr.mxu0 %v391_v1  ;;  %342 = vmatpush3.xpose.msk.msra.mxu1 %vm104_vm0, %v23_v7 }
  0x1c   :  { %321 = vmatpush3.msra.mxu0 %v16_v15  ;;  %343 = vmatprep.subr.mxu1 %v391_v1 }
  0x1d   :  { %322 = vmatprep.subr.mxu0 %v391_v1 }
  0x1e   :  { %323 = vmatpush3.msra.mxu0 %v15_v17 }
  0x1f   :  { %324 = vmatprep.subr.mxu0 %v391_v1  ;;  %344 = vmatpush3.xpose.msk.msra.mxu1 %vm104_vm0, %v22_v8 }
  0x20   :  { %325 = vmatpush3.msra.mxu0 %v14_v18  ;;  %345 = vmatprep.subr.mxu1 %v391_v1 }
  0x21   :  { %327 = vmatmul.mubr.f32.vlgmr.msra.gmra.mxu0 %v30_v19 }
  0x23   :  { %346 = vmatpush3.xpose.msk.msra.mxu1 %vm104_vm0, %v21_v9 }
  0x24   :  { %347 = vmatprep.subr.mxu1 %v391_v1 }
  0x27   :  { %348 = vmatpush3.xpose.msk.msra.mxu1 %vm104_vm0, %v20_v10 }
  0x28   :  { %349 = vmatprep.subr.mxu1 %v391_v1 }
  0x2b   :  { %350 = vmatpush3.xpose.msk.msra.mxu1 %vm104_vm0, %v19_v11 }
  0x2c   :  { %351 = vmatprep.subr.mxu1 %v391_v1 }
  0x2f   :  { %352 = vmatpush3.xpose.msk.msra.mxu1 %vm104_vm0, %v18_v12 }
  0x30   :  { %353 = vmatprep.subr.mxu1 %v391_v1 }
  0x33   :  { %354 = vmatpush3.xpose.msk.msra.mxu1 %vm104_vm0, %v17_v14 }
  0x34   :  { %355 = vmatprep.subr.mxu1 %v391_v1 }
  0x37   :  { %356 = vmatpush3.xpose.msk.msra.mxu1 %vm104_vm0, %v16_v15 }
  0x38   :  { %357 = vmatprep.subr.mxu1 %v391_v1 }
  0x3b   :  { %358 = vmatpush3.xpose.msk.msra.mxu1 %vm104_vm0, %v15_v17 }
  0x3c   :  { %359 = vmatprep.subr.mxu1 %v391_v1 }
  0x3f   :  { %360 = vmatpush3.xpose.msk.msra.mxu1 %vm104_vm0, %v14_v18 }
  0xe1   :  { %v97_v20 = vpop.f32.mrf.mxu0 }
  0xe2   :  { %v101_v21 = vmul.f32 0.03125, %v97_v20 }
  0xe3   :  { %v328_v22 = vpop.f32.mrf.mxu0 }
  0xe4   :  { %v102_v23 = vadd.f32 1.1920929e-07, %v101_v21 }
  0xe6   :  { %367 = vrsqrt.f32 %v102_v23 }
  0xf3   :  { %v368_v24 = vpop.eup %367 }
  0xf4   :  { %362 = vmatmul.mubr.msk.f32.vlgmr.msra.gmra.mxu1 %vm104_vm0, %v368_v24 }
 0x1b4   :  { %v222_v25 = vpop.f32.mrf.mxu1 }
 0x1b5   :  { %v226_v26 = vmul.f32 %v222_v25, %v13_v16 }
 0x1b6   :  { %v363_v27 = vpop.f32.mrf.mxu1 }
 0x1b7   :  { %v227_v28 = vpack.c.bf16 %v226_v26, %v226_v26 }
 0x1b9   :  { %228 = vst [vmem:[#allocation2] sm:$0xf] %v227_v28 }
 0x1ba   :  { %380 = shalt.err (!%p377_p4)
}
 0x1bb   :  { %238 = dma.vmem_to_hbm [thread:$0]  %s236_s14, 64, %s516_s2, [#allocation3]  }
 0x1bc   :  { %389 = dma.done.wait [#allocation3], 64  }
 0x1bd   :  { %390 = vsyncadd [#allocation3], 4294967232 }
 0x1be   :  { %242 = vsyncpa [#allocation3], 1 }

</bundles_post_ra>
